<compile_context>
chip_gen: v7x
topology: tpu7x:2x2x1
jax: 0.10.0
libtpu: 0.0.40
codegen_flags: <defaults>
</compile_context>

<pallas_src>
from functools import partial

import jax
import jax.numpy as jnp
from jax.experimental import pallas as pl
from jax.experimental.pallas import tpu as pltpu

_CHUNK_BYTES_TARGET = 32 * 1024 * 1024   # aim for >= ~32 MiB per DMA descriptor
_MAX_DMA_CHUNKS = 8                      # a handful of in-flight DMAs is plenty
_SMALL_COPY_BYTES = 1 * 1024 * 1024      # below this, skip the custom call


def _make_hbm_copy_kernel(chunk_bounds):
    """Build a kernel issuing one HBM->HBM DMA per static (start, size) chunk."""

    def kernel(x_hbm, o_hbm, sems):
        copies = []
        for idx, (start, size) in enumerate(chunk_bounds):
            cp = pltpu.make_async_copy(
                x_hbm.at[pl.ds(start, size)],
                o_hbm.at[pl.ds(start, size)],
                sems.at[idx],
            )
            cp.start()
            copies.append(cp)
        # All DMAs are in flight before the first wait.
        for cp in copies:
            cp.wait()

    return kernel


@partial(jax.jit, static_argnames=("chunk_bytes",))
def _pallas_hbm_copy(x, chunk_bytes=_CHUNK_BYTES_TARGET):
    """Materialized copy of x via direct HBM->HBM DMA (no VMEM staging)."""
    if x.size == 0 or x.ndim == 0:
        return x

    itemsize = jnp.dtype(x.dtype).itemsize
    nbytes = x.size * itemsize
    dim0 = x.shape[0]
    n_chunks = int(max(1, min(_MAX_DMA_CHUNKS, dim0, nbytes // max(1, chunk_bytes))))

    # Static, near-equal split of the leading dim.
    base, rem = divmod(dim0, n_chunks)
    bounds, start = [], 0
    for i in range(n_chunks):
        size = base + (1 if i < rem else 0)
        bounds.append((start, size))
        start += size

    return pl.pallas_call(
        _make_hbm_copy_kernel(tuple(bounds)),
        out_shape=jax.ShapeDtypeStruct(x.shape, x.dtype),
        in_specs=[pl.BlockSpec(memory_space=pl.ANY)],
        out_specs=pl.BlockSpec(memory_space=pl.ANY),
        scratch_shapes=[pltpu.SemaphoreType.DMA((n_chunks,))],
        cost_estimate=pl.CostEstimate(
            flops=0, transcendentals=0, bytes_accessed=2 * nbytes),
    )(x)


def identity_first_stage_forward(x, *args, use_pallas_copy=False, **kwargs):
    """Pallas equivalent of IdentityFirstStage.forward.

    Default (optimal) path: the identity is a no-op, so x is returned directly
    — zero HBM traffic, zero kernel-launch cost.  With use_pallas_copy=True a
    materialized copy is produced via HBM->HBM DMA, except for small inputs
    where launch overhead dominates and x is returned as-is.
    """
    if not use_pallas_copy:
        return x
    if x.size * jnp.dtype(x.dtype).itemsize < _SMALL_COPY_BYTES:
        return x
    return _pallas_hbm_copy(x)


def identity_first_stage_encode(x, *args, **kwargs):
    return identity_first_stage_forward(x, *args, **kwargs)


def identity_first_stage_decode(x, *args, **kwargs):
    return identity_first_stage_forward(x, *args, **kwargs)


def identity_first_stage_quantize(x, *args, vq_interface=False, **kwargs):
    y = identity_first_stage_forward(x, *args, **kwargs)
    if vq_interface:
        return (y, None, [None, None, None])
    return y


if __name__ == "__main__":
    key = jax.random.PRNGKey(0)
    # Small NCHW input consistent with the (identity) forward pass.
    x = jax.random.normal(key, (2, 4, 16, 16), dtype=jnp.float32)

    # Optimal path: no kernel launched, x returned as-is.
    y_fast = identity_first_stage_forward(x)
    y_fast = jax.block_until_ready(y_fast)
    assert y_fast.shape == x.shape and y_fast.dtype == x.dtype
    assert bool(jnp.all(y_fast == x))

    # use_pallas_copy on a small input takes the documented small-size fast path.
    y_small = identity_first_stage_forward(x, use_pallas_copy=True)
    y_small = jax.block_until_ready(y_small)
    assert bool(jnp.all(y_small == x))

    # Exercise the HBM->HBM DMA kernel directly: single-DMA path ...
    y_copy1 = jax.block_until_ready(_pallas_hbm_copy(x))
    assert y_copy1.shape == x.shape and y_copy1.dtype == x.dtype
    assert bool(jnp.all(y_copy1 == x))

    # ... and the multi-chunk path (2 chunks / 2 semaphores on this 8 KiB input).
    y_copy2 = jax.block_until_ready(_pallas_hbm_copy(x, chunk_bytes=4096))
    assert bool(jnp.all(y_copy2 == x))

    # quantize() with the vq_interface branch (glue-level only).
    q, _, extras = identity_first_stage_quantize(x, vq_interface=True)
    q = jax.block_until_ready(q)
    assert bool(jnp.all(q == x)) and extras == [None, None, None]

    print("KERNEL_OK")
</pallas_src>

<mosaic_0001>
module attributes {stable_mosaic.version = 11 : i64} {
  func.func @kernel(%arg0: memref<2x4x16x16xf32, #tpu.memory_space<any>>, %arg1: memref<2x4x16x16xf32, #tpu.memory_space<any>>, %arg2: memref<1x!tpu.dma_semaphore, #tpu.memory_space<semaphore_mem>>) attributes {dimension_semantics = [], scalar_prefetch = 0 : i64, scratch_operands = 1 : i64, tpu.core_type = #tpu.core_type<tc>} {
    %c0_i32 = arith.constant 0 : i32
    %c0_i32_0 = arith.constant 0 : i32
    %c0_i32_1 = arith.constant 0 : i32
    %c0_i32_2 = arith.constant 0 : i32
    %c0_i32_3 = arith.constant 0 : i32
    %0 = tpu.memref_slice %arg0[%c0_i32_0, %c0_i32_1, %c0_i32_2, %c0_i32_3] : memref<2x4x16x16xf32, #tpu.memory_space<any>> -> memref<2x4x16x16xf32, #tpu.memory_space<any>>
    %c0_i32_4 = arith.constant 0 : i32
    %c0_i32_5 = arith.constant 0 : i32
    %c0_i32_6 = arith.constant 0 : i32
    %c0_i32_7 = arith.constant 0 : i32
    %1 = tpu.memref_slice %arg1[%c0_i32_4, %c0_i32_5, %c0_i32_6, %c0_i32_7] : memref<2x4x16x16xf32, #tpu.memory_space<any>> -> memref<2x4x16x16xf32, #tpu.memory_space<any>>
    %2 = tpu.memref_slice %arg2[%c0_i32] : memref<1x!tpu.dma_semaphore, #tpu.memory_space<semaphore_mem>> -> memref<1x!tpu.dma_semaphore, #tpu.memory_space<semaphore_mem>>
    %3 = tpu.memref_squeeze %2 : memref<1x!tpu.dma_semaphore, #tpu.memory_space<semaphore_mem>> -> memref<!tpu.dma_semaphore, #tpu.memory_space<semaphore_mem>>
    tpu.enqueue_dma source(%0 : memref<2x4x16x16xf32, #tpu.memory_space<any>>) target(%1 : memref<2x4x16x16xf32, #tpu.memory_space<any>>) target_semaphore(%3 : memref<!tpu.dma_semaphore, #tpu.memory_space<semaphore_mem>>)
    %c0_i32_8 = arith.constant 0 : i32
    %c0_i32_9 = arith.constant 0 : i32
    %c0_i32_10 = arith.constant 0 : i32
    %c0_i32_11 = arith.constant 0 : i32
    %c0_i32_12 = arith.constant 0 : i32
    %4 = tpu.memref_slice %arg0[%c0_i32_9, %c0_i32_10, %c0_i32_11, %c0_i32_12] : memref<2x4x16x16xf32, #tpu.memory_space<any>> -> memref<2x4x16x16xf32, #tpu.memory_space<any>>
    %c0_i32_13 = arith.constant 0 : i32
    %c0_i32_14 = arith.constant 0 : i32
    %c0_i32_15 = arith.constant 0 : i32
    %c0_i32_16 = arith.constant 0 : i32
    %5 = tpu.memref_slice %arg1[%c0_i32_13, %c0_i32_14, %c0_i32_15, %c0_i32_16] : memref<2x4x16x16xf32, #tpu.memory_space<any>> -> memref<2x4x16x16xf32, #tpu.memory_space<any>>
    %6 = tpu.memref_slice %arg2[%c0_i32_8] : memref<1x!tpu.dma_semaphore, #tpu.memory_space<semaphore_mem>> -> memref<1x!tpu.dma_semaphore, #tpu.memory_space<semaphore_mem>>
    %7 = tpu.memref_squeeze %6 : memref<1x!tpu.dma_semaphore, #tpu.memory_space<semaphore_mem>> -> memref<!tpu.dma_semaphore, #tpu.memory_space<semaphore_mem>>
    tpu.wait_dma2 semaphore(%7 : memref<!tpu.dma_semaphore, #tpu.memory_space<semaphore_mem>>) src(%4 : memref<2x4x16x16xf32, #tpu.memory_space<any>>) dst(%5 : memref<2x4x16x16xf32, #tpu.memory_space<any>>)
    return
  }
}

</mosaic_0001>

<bundles_post_ra>
// kernel: _pallas_hbm_copy.1
= control target key start
LH: loop header
LB: loop body
LE: loop exit
PB: predicated region body
PF: predicated region fallthrough
CT: control target
= control target key end

     0   :  { %s36_s6 = smov [#allocation2]   ;;  %s37_s7 = smov [#allocation3]   ;;  %s55_s0 = inlined_call_operand.hbm [shape: f32[2,4,16,16], index: 0, kind: input, shape index: {}]   ;;  %s56_s1 = inlined_call_operand.hbm [shape: f32[2,4,16,16], index: 1, kind: output, shape index: {}]  }
   0x1   :  { %s38_s8 = smov 0  }
   0x2   :  { %18 = dma.general %s55_s0, 2048, %s56_s1, %s36_s6, %s37_s7, [#allocation4], %s38_s8, 0  }
   0x3   :  { %34 = dma.done.wait [#allocation2], 2048 }
   0x4   :  { %35 = vsyncadd [#allocation2], 4294965248 }
   0x5   :  { %24 = vsyncmov [#allocation2] }
   0x8   :  { %s25_s13 = vpop.sfrf %24 }
   0x9   :  { %p30_p0 = scmp.ne.s32.totalorder %s25_s13, 0 }
   0xb   :  { %29 = shalt.err (%p30_p0)  }

</bundles_post_ra>
